<compile_context>
chip_gen: v6e
topology: v6e:2x2x1
jax: 0.10.0
libtpu: 0.0.40
codegen_flags: <defaults>
</compile_context>

<pallas_src>
import functools
import math

import jax
import jax.numpy as jnp
from jax.experimental import pallas as pl
from jax.experimental.pallas import tpu as pltpu


def _gcn_kernel(x_ref, adj_ref, w_ref, b_ref, out_ref, *, apply_relu, reorder):
    # x_ref:   (bt, N, in_dim)
    # adj_ref: (bt, N, N)
    # w_ref:   (in_dim, out_dim)   pre-transposed nn.Linear weight
    # b_ref:   (1, out_dim)        f32
    # out_ref: (bt, N, out_dim)
    bt, n, in_dim = x_ref.shape
    out_dim = w_ref.shape[1]

    adj = adj_ref[...]
    if reorder:
        # adj @ (xW + b) == (adj @ x) @ W + rowsum(adj) * b
        # Fewer MXU FLOPs and a smaller intermediate when in_dim < out_dim.
        ax = jnp.einsum("bnm,bmd->bnd", adj, x_ref[...],
                        preferred_element_type=jnp.float32)
        h = jnp.dot(ax.reshape(bt * n, in_dim), w_ref[...],
                    preferred_element_type=jnp.float32).reshape(bt, n, out_dim)
        rowsum = jnp.sum(adj.astype(jnp.float32), axis=-1, keepdims=True)
        out = h + rowsum * b_ref[...]
    else:
        # Linear with batch folded into the matmul M dimension (one MXU pass),
        # then per-batch graph aggregation on the resident tile.
        h = jnp.dot(x_ref[...].reshape(bt * n, in_dim), w_ref[...],
                    preferred_element_type=jnp.float32) + b_ref[...]
        h = h.reshape(bt, n, out_dim)
        out = jnp.einsum("bnm,bmd->bnd", adj, h,
                         preferred_element_type=jnp.float32)

    if apply_relu:
        out = jnp.maximum(out, 0.0)
    out_ref[...] = out.astype(out_ref.dtype)
    # TODO(synk): BatchNorm1d(n_atom) path (use_bn=True) needs cross-batch
    # statistics; not implemented here (module default is bn=False).


def _vmem_budget_bytes():
    """Generation-aware VMEM budget (also used as vmem_limit_bytes)."""
    cap = 0
    try:
        cap = int(getattr(pltpu.get_tpu_info(), "vmem_capacity_bytes", 0))
    except Exception:
        cap = 0
    if cap >= 100 * 1024 * 1024:       # 128 MiB parts (v5e / v6e)
        return 96 * 1024 * 1024
    return 48 * 1024 * 1024            # 64 MiB-per-TC parts (v7x) or unknown


def _choose_batch_tile(B, n_pad, in_dim, out_dim, budget_bytes):
    """VMEM-budget-driven batch tile; keeps enough parallel grid iterations
    for megacore sharding + pipelining. Returns (bt, padded_B)."""
    itemsize = 4
    # Double-buffered per-step tiles (x, adj, out) + resident intermediate.
    per_b = 2 * (n_pad * in_dim + n_pad * n_pad + n_pad * out_dim) * itemsize
    per_b += n_pad * max(in_dim, out_dim) * itemsize
    # Weights / bias (counted double-buffered; conservative).
    fixed = 2 * (in_dim * out_dim + 8 * max(out_dim, 128)) * itemsize
    usable = int(budget_bytes * 0.75) - fixed
    cap = max(1, usable // max(per_b, 1))
    # v7x has 2 TCs: with B >= 4 keep >= 4 grid steps so each core gets >= 2
    # (otherwise the adj/x DMA of the single step is fully exposed).
    min_iters = 4 if B >= 4 else (2 if B >= 2 else 1)
    cap = max(1, min(cap, max(1, B // min_iters)))
    divisors = [d for d in range(1, cap + 1) if B % d == 0]
    bt = max(divisors) if divisors else 1
    if bt == 1 and cap > 1:
        # Awkward B (e.g. prime): pad the batch instead of degrading to bt=1.
        bt = cap
    b_pad = ((B + bt - 1) // bt) * bt
    return bt, b_pad


def gcn_layer_forward(x, adj, w, b, *, activation=None, compute_dtype=None):
    """Pallas GCNLayer forward. Returns (out, adj), matching the PyTorch module.

    x:   (B, n_atom, in_dim) f32
    adj: (B, n_atom, n_atom) f32
    w:   (out_dim, in_dim)   f32  (nn.Linear weight layout)
    b:   (out_dim,)          f32
    compute_dtype: optional reduced precision (e.g. jnp.bfloat16) for x/adj/W;
                   accumulation, bias and activation stay f32.
    """
    if activation not in (None, "relu"):
        raise NotImplementedError(f"activation {activation!r} is not supported")

    B, N, in_dim = x.shape
    out_dim = w.shape[0]

    # Pre-transpose W once in the wrapper: no per-step in-kernel relayout.
    wt = jnp.asarray(w).T                     # (in_dim, out_dim)
    bp = jnp.asarray(b).reshape(1, out_dim).astype(jnp.float32)

    if compute_dtype is not None:
        x_in = x.astype(compute_dtype)
        adj_in = adj.astype(compute_dtype)
        wt = wt.astype(compute_dtype)
    else:
        x_in, adj_in = x, adj

    # Pad n_atom to a multiple of 8 so the in-kernel (bt*N, d) fold does not
    # cross (8,128) sublane tile boundaries (padded rows/cols are zero: inert).
    n_pad = ((N + 7) // 8) * 8
    if n_pad != N:
        x_in = jnp.zeros((B, n_pad, in_dim), x_in.dtype).at[:, :N].set(x_in)
        adj_in = jnp.zeros((B, n_pad, n_pad), adj_in.dtype).at[:, :N, :N].set(adj_in)

    budget = _vmem_budget_bytes()
    bt, b_pad = _choose_batch_tile(B, n_pad, in_dim, out_dim, budget)
    if b_pad != B:
        x_in = jnp.zeros((b_pad, n_pad, in_dim), x_in.dtype).at[:B].set(x_in)
        adj_in = jnp.zeros((b_pad, n_pad, n_pad), adj_in.dtype).at[:B].set(adj_in)

    grid = (b_pad // bt,)
    reorder = in_dim < out_dim
    kernel = functools.partial(
        _gcn_kernel, apply_relu=(activation == "relu"), reorder=reorder)

    flops = (2 * b_pad * n_pad * in_dim * out_dim
             + 2 * b_pad * n_pad * n_pad * (in_dim if reorder else out_dim))
    bytes_accessed = (x_in.size * x_in.dtype.itemsize
                      + adj_in.size * adj_in.dtype.itemsize
                      + wt.size * wt.dtype.itemsize
                      + bp.size * bp.dtype.itemsize
                      + b_pad * n_pad * out_dim * x.dtype.itemsize)

    out_p = pl.pallas_call(
        kernel,
        out_shape=jax.ShapeDtypeStruct((b_pad, n_pad, out_dim), x.dtype),
        grid_spec=pltpu.PrefetchScalarGridSpec(
            num_scalar_prefetch=0,
            grid=grid,
            in_specs=[
                pl.BlockSpec((bt, n_pad, in_dim), lambda i: (i, 0, 0)),
                pl.BlockSpec((bt, n_pad, n_pad), lambda i: (i, 0, 0)),
                # Grid-invariant index maps: weights / bias DMA'd once.
                pl.BlockSpec((in_dim, out_dim), lambda i: (0, 0)),
                pl.BlockSpec((1, out_dim), lambda i: (0, 0)),
            ],
            # Full-extent out_dim block: no output padding, no wrapper slice,
            # no extra HBM pass (masked stores are cheaper than 4x writeback
            # for small out_dim).
            out_specs=pl.BlockSpec((bt, n_pad, out_dim), lambda i: (i, 0, 0)),
        ),
        compiler_params=pltpu.CompilerParams(
            dimension_semantics=("parallel",),
            vmem_limit_bytes=budget,
        ),
        cost_estimate=pl.CostEstimate(
            flops=flops, transcendentals=0, bytes_accessed=bytes_accessed),
    )(x_in, adj_in, wt, bp)

    out = out_p
    if b_pad != B:
        out = out[:B]
    if n_pad != N:
        out = out[:, :N]
    return out, adj


def init_params(key, in_dim, out_dim):
    """Deterministic init matching nn.Linear + xavier_uniform_ on the weight."""
    kw, kb = jax.random.split(key)
    # xavier_uniform_: U(-a, a), a = sqrt(6 / (fan_in + fan_out))
    a = math.sqrt(6.0 / (in_dim + out_dim))
    w = jax.random.uniform(kw, (out_dim, in_dim), jnp.float32, minval=-a, maxval=a)
    # nn.Linear default bias init: U(-1/sqrt(fan_in), 1/sqrt(fan_in))
    bb = 1.0 / math.sqrt(in_dim)
    b = jax.random.uniform(kb, (out_dim,), jnp.float32, minval=-bb, maxval=bb)
    return w, b


if __name__ == "__main__":
    key = jax.random.PRNGKey(0)
    k_x, k_adj, k_p = jax.random.split(key, 3)

    B, n_atom, in_dim, out_dim = 2, 16, 8, 32

    x = jax.random.normal(k_x, (B, n_atom, in_dim), jnp.float32)
    # simple symmetric "adjacency-like" matrix with self loops
    a = jax.random.uniform(k_adj, (B, n_atom, n_atom), jnp.float32)
    adj = 0.5 * (a + jnp.swapaxes(a, 1, 2)) + jnp.eye(n_atom)[None]

    w, b = init_params(k_p, in_dim, out_dim)

    out, adj_out = gcn_layer_forward(x, adj, w, b, activation=None)
    jax.block_until_ready(out)
    jax.block_until_ready(adj_out)

    # sanity check against plain-JAX reference
    ref = jnp.einsum("bnm,bmd->bnd", adj, x @ w.T + b[None, None, :])
    assert out.shape == (B, n_atom, out_dim)
    assert jnp.allclose(out, ref, atol=1e-3, rtol=1e-4)
    assert jnp.array_equal(adj_out, adj)

    print("KERNEL_OK")
</pallas_src>

<mosaic_0001>
module attributes {stable_mosaic.version = 11 : i64} {
  func.func @_gcn_kernel(%arg0: i32, %arg1: memref<1x16x8xf32, #tpu.memory_space<vmem>>, %arg2: memref<1x16x16xf32, #tpu.memory_space<vmem>>, %arg3: memref<8x32xf32, #tpu.memory_space<vmem>>, %arg4: memref<1x32xf32, #tpu.memory_space<vmem>>, %arg5: memref<1x16x32xf32, #tpu.memory_space<vmem>>) attributes {dimension_semantics = [#tpu.dimension_semantics<parallel>], iteration_bounds = array<i64: 2>, scalar_prefetch = 0 : i64, scratch_operands = 0 : i64, tpu.core_type = #tpu.core_type<tc>, window_params = [{transform_indices = @transform_0, window_bounds = array<i64: 1, 16, 8>}, {transform_indices = @transform_1, window_bounds = array<i64: 1, 16, 16>}, {pipeline_mode = #tpu.pipeline_mode<synchronous>, transform_indices = @transform_2, window_bounds = array<i64: 8, 32>}, {pipeline_mode = #tpu.pipeline_mode<synchronous>, transform_indices = @transform_3, window_bounds = array<i64: 1, 32>}, {transform_indices = @transform_4, window_bounds = array<i64: 1, 16, 32>}]} {
    %c0 = arith.constant 0 : index
    %c0_0 = arith.constant 0 : index
    %c0_1 = arith.constant 0 : index
    %0 = vector.load %arg2[%c0, %c0_0, %c0_1] : memref<1x16x16xf32, #tpu.memory_space<vmem>>, vector<1x16x16xf32>
    %c0_2 = arith.constant 0 : index
    %c0_3 = arith.constant 0 : index
    %c0_4 = arith.constant 0 : index
    %1 = vector.load %arg1[%c0_2, %c0_3, %c0_4] : memref<1x16x8xf32, #tpu.memory_space<vmem>>, vector<1x16x8xf32>
    "tpu.trace_start"() <{level = 10 : i32, message = "bnm,bmd->bnd"}> : () -> ()
    %cst = arith.constant dense<0.000000e+00> : vector<1x16x8xf32>
    %2 = tpu.matmul %0, %1, %cst {dimension_numbers = #tpu.dot_dimension_numbers<[2], [1], [1], [2], [0, 0, 0, 1, 1, 2], [0], [0]>} : vector<1x16x16xf32>, vector<1x16x8xf32>, vector<1x16x8xf32> -> vector<1x16x8xf32>
    "tpu.trace_stop"() : () -> ()
    %3 = vector.shape_cast %2 : vector<1x16x8xf32> to vector<16x8xf32>
    %c0_5 = arith.constant 0 : index
    %c0_6 = arith.constant 0 : index
    %4 = vector.load %arg3[%c0_5, %c0_6] : memref<8x32xf32, #tpu.memory_space<vmem>>, vector<8x32xf32>
    %cst_7 = arith.constant dense<0.000000e+00> : vector<16x32xf32>
    %5 = tpu.matmul %3, %4, %cst_7 {dimension_numbers = #tpu.dot_dimension_numbers<[1], [0], [0], [1], [0, 0, 1, 1], [], []>} : vector<16x8xf32>, vector<8x32xf32>, vector<16x32xf32> -> vector<16x32xf32>
    %6 = vector.shape_cast %5 : vector<16x32xf32> to vector<1x16x32xf32>
    %cst_8 = arith.constant dense<0.000000e+00> : vector<1x16xf32>
    %7 = vector.multi_reduction <add>, %0, %cst_8 [2] : vector<1x16x16xf32> to vector<1x16xf32>
    %8 = vector.shape_cast %7 : vector<1x16xf32> to vector<1x16x1xf32>
    %c0_9 = arith.constant 0 : index
    %c0_10 = arith.constant 0 : index
    %9 = vector.load %arg4[%c0_9, %c0_10] : memref<1x32xf32, #tpu.memory_space<vmem>>, vector<1x32xf32>
    %10 = vector.shape_cast %9 : vector<1x32xf32> to vector<1x1x32xf32>
    %11 = vector.broadcast %8 : vector<1x16x1xf32> to vector<1x16x32xf32>
    %12 = vector.broadcast %10 : vector<1x1x32xf32> to vector<1x16x32xf32>
    %13 = arith.mulf %11, %12 : vector<1x16x32xf32>
    %14 = arith.addf %6, %13 : vector<1x16x32xf32>
    %c0_11 = arith.constant 0 : index
    %c0_12 = arith.constant 0 : index
    %c0_13 = arith.constant 0 : index
    %15 = vector.load %arg5[%c0_11, %c0_12, %c0_13] : memref<1x16x32xf32, #tpu.memory_space<vmem>>, vector<1x16x32xf32>
    tpu.vector_store %arg5[%c0_11, %c0_12, %c0_13], %14 {strides = array<i32>} : memref<1x16x32xf32, #tpu.memory_space<vmem>>, vector<1x16x32xf32>,
    return
  }
  func.func @transform_0(%arg0: i32) -> (i32, i32, i32) {
    %c0_i32 = arith.constant 0 : i32
    %c0_i32_0 = arith.constant 0 : i32
    %c0_i32_1 = arith.constant 0 : i32
    return %arg0, %c0_i32, %c0_i32_0 : i32, i32, i32
  }
  func.func @transform_1(%arg0: i32) -> (i32, i32, i32) {
    %c0_i32 = arith.constant 0 : i32
    %c0_i32_0 = arith.constant 0 : i32
    %c0_i32_1 = arith.constant 0 : i32
    return %arg0, %c0_i32, %c0_i32_0 : i32, i32, i32
  }
  func.func @transform_2(%arg0: i32) -> (i32, i32) {
    %c0_i32 = arith.constant 0 : i32
    %c0_i32_0 = arith.constant 0 : i32
    %c0_i32_1 = arith.constant 0 : i32
    return %c0_i32, %c0_i32_0 : i32, i32
  }
  func.func @transform_3(%arg0: i32) -> (i32, i32) {
    %c0_i32 = arith.constant 0 : i32
    %c0_i32_0 = arith.constant 0 : i32
    %c0_i32_1 = arith.constant 0 : i32
    return %c0_i32, %c0_i32_0 : i32, i32
  }
  func.func @transform_4(%arg0: i32) -> (i32, i32, i32) {
    %c0_i32 = arith.constant 0 : i32
    %c0_i32_0 = arith.constant 0 : i32
    %c0_i32_1 = arith.constant 0 : i32
    return %arg0, %c0_i32, %c0_i32_0 : i32, i32, i32
  }
}

</mosaic_0001>

<bundles_post_ra>
// kernel: tpu_custom_call.1
= control target key start
LH: loop header
LB: loop body
LE: loop exit
PB: predicated region body
PF: predicated region fallthrough
CT: control target
= control target key end

     0   :  { %9 = vsyncpa [#allocation3], 0  ;;  %s780_s0 = inlined_call_operand.vmem [shape: f32[2,16,8], index: 0, kind: input, shape index: {}]   ;;  %s781_s1 = inlined_call_operand.vmem [shape: f32[2,16,16], index: 1, kind: input, shape index: {}]   ;;  %s782_s2 = inlined_call_operand.vmem [shape: f32[8,32], index: 2, kind: input, shape index: {}]   ;;  %s783_s3 = inlined_call_operand.vmem [shape: f32[1,32], index: 3, kind: input, shape index: {}]   ;;  %s784_s4 = inlined_call_operand.hbm [shape: f32[2,16,32], index: 4, kind: output, shape index: {}]  }
   0x1   :  { %11 = vsyncpa [#allocation3 + $0x1], 0  ;;  %s665_s15 = smov 0   ;;  %s667_s16 = smov 0  }
   0x2   :  { %s669_s17 = smov 0   ;;  %s671_s18 = smov 0  }
   0x3 LB: > { %s686_s19 = sadd.s32 4294967295, %s635_s18   ;;  %s493_s20 = sadd.s32 4294967294, %s635_s18   ;;  %s635_s18 = sphi %s671_s18, %s790_s18   ;;  %s631_s17 = sphi %s669_s17, %s789_s17   ;;  %s627_s16 = sphi %s667_s16, %s788_s16   ;;  %s623_s15 = sphi %s665_s15, %s787_s15  }
   0x4   : > { %s690_s21 = sadd.s32 1, %s635_s18   ;;  %s118_s22 = sadd.s32 1, %s631_s17 }
   0x5   : > { %s115_s23 = ssub.s32 %s635_s18, %s690_s21  ;;  %p128_p0 = scmp.ne.s32.totalorder %s631_s17, %s627_s16 }
   0x6   : > { %p116_p1 = scmp.eq.s32.totalorder %s115_s23, 0  ;;  %p129_p2 = scmp.eq.s32.totalorder %s686_s19, 1 }
   0x7   : > { %p134_p3 = scmp.ne.s32.totalorder %s627_s16, %s623_s15  ;;  %p135_p4 = scmp.eq.s32.totalorder %s493_s20, 1 }
   0x8   : > { %s701_s24 = scalar_select %p116_p1, %s631_s17, %s118_s22  }
   0x9   : > { %p703_p5 = por %p129_p2, %p128_p0  ;;  %p707_p6 = por %p135_p4, %p134_p3 }
   0xa   : > { %p496_p7 = scmp.ge.s32.totalorder %s635_s18, 1  ;;  %p175_p8 = scmp.lt.s32.totalorder %s635_s18, 3 }
   0xc   : > { %p176_p9 = pnand %p496_p7, %p175_p8 }
   0xd   : > { %p206_p10 = scmp.lt.s32.totalorder (!%p176_p9), %s686_s19, 1  ;;  %s203_s11 = sand.u32 (!%p176_p9), 1, %s627_s16  }
   0xe   : > { %179 = sbr.rel (%p176_p9) target bundleno = 435 (0x1b3), region = 36  ;;  %s497_s12 = sshll.u32 (!%p176_p9), %s203_s11, 4 }
   0xf   : > { %s205_s20 = scalar_lea.vmem (!%p176_p9), [#allocation2], %s497_s12  ;;  %s514_s23 = sshll.u32 (!%p176_p9), %s686_s19, 8 }
  0x10   : > { %s419_s22 = sshll.u32 (!%p176_p9), %s205_s20, 4  ;;  %s738_s29 = scalar_lea.hbm (!%p176_p9), %s784_s4, %s514_s23  ;;  %s733_s22 = int_to_ptr.vmem [resolvable:$true] %s419_s22 }
  0x11   : > { %s740_s30 = scalar_lea.sflag (!%p176_p9), [#allocation3], %s203_s11 }
  0x13   : > { %s207_s27 = scalar_select %p206_p10, %s686_s19, 1  ;;  %vm220_vm0 = vcmask 130048   ;;  %v302_v4 = vld [vmem:[%s782_s2] sm:$0xff]  ;;  %vm303_vm1 = vcmask 64512   ;;  %vm402_vm2 = vcmask 261120  }
  0x14   : > { %529 = vmatprep.subr.mxu1 %v302_v4  ;;  %v506_v11 = vld [vmem:[%s783_s3] ss:$0 sm:$0xff]  ;;  %s575_s19 = scalar_lea.vmem %s733_s22, 256 }
  0x15   : > { %s512_s28 = sshll.u32 %s207_s27, 4  ;;  %530 = vmatpush3.msra.mxu1 %v302_v4  ;;  %p576_p11 = scmp.ne.s32.totalorder %s733_s22, %s575_s19 }
  0x16   : > { %s210_s5 = scalar_lea.vmem %s780_s0, %s512_s28  ;;  %s215_s8 = scalar_lea.vmem %s781_s1, %s512_s28 }
  0x17   : > { %v219_v0 = vld [vmem:[%s210_s5 + $0x8] sm:$0xff]  ;;  %v218_v1 = vld [vmem:[%s210_s5] sm:$0xff]  ;;  %p577_p12 = pnand %p576_p11, %p703_p5  ;;  %s637_s5 = smov [#allocation2]  }
  0x18   : > { %v216_v2 = vld [vmem:[%s215_s8] sm:$0xff]  ;;  %522 = vmatprep.subr.mxu0 %v219_v0  ;;  %v217_v3 = vld [vmem:[%s215_s8 + $0x8] sm:$0xff]  ;;  %s579_s6 = sshll.u32 %s637_s5, 4  ;;  %s580_s6 = int_to_ptr.vmem [resolvable:$false] %s579_s6 }
  0x19   : > { %526 = vmatprep.mubr.msk.f32.mxu0 %vm220_vm0, %v216_v2  ;;  %523 = vmatpush3.msra.mxu0 %v219_v0  ;;  %v385_v5 = vsel %vm220_vm0, %v216_v2, 0.0  ;;  %v388_v6 = vsel %vm220_vm0, %v217_v3, 0.0  ;;  %p578_p13 = pneg %p577_p12  ;;  %s581_s7 = scalar_lea.vmem %s580_s6, 512 }
  0x1a   : > { %524 = vmatprep.subr.mxu0 %v218_v1  ;;  %386 = vadd.xlane.f32.xlu0 %v385_v5  ;;  %p582_p0 = scmp.lt.s32.totalorder %s733_s22, %s580_s6  ;;  %p583_p1 = scmp.lt.s32.totalorder %s581_s7, %s575_s19 }
  0x1b   : > { %525 = vmatpush3.msra.mxu0 %v218_v1 }
  0x1c   : > { %527 = vmatmul.mubr.msk.f32.vlgmr.msra.gmra.mxu0 %vm220_vm0, %v217_v3  ;;  %p584_p2 = por %p583_p1, %p582_p0 }
  0x1e   : > { %389 = vadd.xlane.f32.xlu0 %v388_v6  ;;  %p585_p3 = pnand %p584_p2, %p578_p13 }
  0xa3   : > { %v387_v9 = vpop.xlane.xlu0 %386 }
  0xa4   : > { %v398_v14 = vmul.f32 %v506_v11, %v387_v9 }
  0xa7   : > { %v390_v10 = vpop.xlane.xlu0 %389 }
  0xa8   : > { %v399_v12 = vmul.f32 %v506_v11, %v390_v10 }
  0xdc   : > { %v528_v7 = vpop.f32.mrf.mxu0 }
  0xde   : > { %v293_v8 = vpop.f32.mrf.mxu0 }
  0xdf   : > { %531 = vmatprep.mubr.msk.f32.mxu1 %vm303_vm1, %v293_v8 }
  0xe0   : > { %532 = vmatmul.mubr.msk.f32.vlgmr.msra.gmra.mxu1 %vm303_vm1, %v528_v7 }
 0x1a0   : > { %v533_v13 = vpop.f32.mrf.mxu1 }
 0x1a1   : > { %v401_v15 = vadd.f32 %v533_v13, %v399_v12 }
 0x1a2   : > { %v376_v16 = vpop.f32.mrf.mxu1 }
 0x1a3   : > { %404 = vst.msk [vmem:[%s205_s20 + $0x8] sm:$0xff] %vm402_vm2, %v401_v15  ;;  %v400_v17 = vadd.f32 %v398_v14, %v376_v16 }
 0x1a5   : > { %403 = vst.msk [vmem:[%s205_s20] sm:$0xff] %vm402_vm2, %v400_v17 }
 0x1a6   : > { %588 = shalt.err (!%p585_p3)
}
 0x1a7   : > { %s589_s8 = scalar_lea.hbm %s738_s29, 256  ;;  %s593_s11 = scalar_lea.hbm %s784_s4, 512 }
 0x1a8   : > { %p590_p4 = scmp.ne.s32.totalorder %s738_s29, %s589_s8  ;;  %p594_p9 = scmp.lt.s32.totalorder %s738_s29, %s784_s4 }
 0x1a9   : > { %p595_p10 = scmp.lt.s32.totalorder %s593_s11, %s589_s8 }
 0x1aa   : > { %p591_p7 = pnand %p590_p4, %p703_p5 }
 0x1ab   : > { %p596_p11 = por %p595_p10, %p594_p9 }
 0x1ac   : > { %p592_p8 = pneg %p591_p7 }
 0x1ae   : > { %p597_p12 = pnand %p596_p11, %p592_p8 }
 0x1b0   : > { %600 = shalt.err (!%p597_p12)
}
 0x1b1   : > { %s638_s14 = smov 128   ;;  %s639_s20 = smov 8  }
 0x1b2   : > { %534 = dma.vmem_to_hbm [thread:$0]  (%p703_p5), %s733_s22, 256, %s738_s29, %s740_s30, %s638_s14, %s638_s14, %s639_s20  }
 0x1b3 PF: > { %p540_p13 = scmp.ge.s32.totalorder %s635_s18, 2  ;;  %s434_s23 = sand.u32 1, %s623_s15  }
 0x1b4   : > { %s435_s27 = scalar_lea.sflag [#allocation3], %s434_s23 }
 0x1b5   : > { %p537_p0 = pnand %p540_p13, %p707_p6 }
 0x1b7   : > { %p538_p1 = pneg %p537_p0 }
 0x1b9   : > { %618 = dma.done.wait (%p538_p1), %s435_s27, 256  }
 0x1ba   : > { %620 = vsyncadd (%p538_p1), %s435_s27, 4294967040  ;;  %p14_p2 = scmp.ge.s32.totalorder %s690_s21, 4   ;;  %s787_s15 = smov %s627_s16 }
 0x1bb   : > { %s788_s16 = smov %s631_s17  ;;  %s789_s17 = smov %s701_s24 }
 0x1bc   : > { %s790_s18 = smov %s690_s21  ;;  %16 = sbr.rel (!%p14_p2) target bundleno = 3 (0x3), region = 74 }
 0x1c1   :  { %440 = vsyncpa [#allocation3], 1 }
 0x1c2   :  { %442 = vsyncpa [#allocation3 + $0x1], 1 }

</bundles_post_ra>
